<compile_context>
chip_gen: v5e
topology: v5e:2x2
jax: 0.10.0
libtpu: 0.0.40
codegen_flags: <defaults>
</compile_context>

<pallas_src>
import math
from functools import partial

import jax
import jax.numpy as jnp
from jax import lax
from jax.experimental import pallas as pl
from jax.experimental.pallas import tpu as pltpu


# ----------------------------------------------------------------------------
# Helpers
# ----------------------------------------------------------------------------

def _mm(a, b):
    """a @ b with f32 accumulation on the MXU."""
    return lax.dot_general(a, b, (((1,), (0,)), ((), ())),
                           preferred_element_type=jnp.float32)


def _mm_nt(a, b):
    """a @ b.T with f32 accumulation (no materialized transpose)."""
    return lax.dot_general(a, b, (((1,), (1,)), ((), ())),
                           preferred_element_type=jnp.float32)


def _softmax_lastdim(s):
    s = s - jnp.max(s, axis=-1, keepdims=True)
    e = jnp.exp(s)
    return e * pl.reciprocal(jnp.sum(e, axis=-1, keepdims=True), approx=True)


def _vmem_limit(max_bytes=100 * 1024 * 1024, frac=0.85):
    """Explicit scoped-VMEM limit: ~100 MiB on v5e/v6e, ~54 MiB on v7x."""
    try:
        cap = int(pltpu.get_tpu_info().vmem_capacity_bytes)
    except Exception:
        cap = 64 * 1024 * 1024
    return int(min(cap * frac, max_bytes))


# ----------------------------------------------------------------------------
# Fused TransLayer kernel:
#   out = x + to_out(NystromAttention(LayerNorm(x)))        (whole layer, 1 call)
# ----------------------------------------------------------------------------

def _translayer_kernel(x_ref, g_ref, b_ref, wqkv_ref, wres_ref, wout_ref,
                       bout_ref, o_ref, vpad_ref, *,
                       heads, dh, nl, l, pad_len, iters, scale):
    npad, dim = x_ref.shape
    inner = heads * dh
    hnl = heads * nl

    # ---- LayerNorm (f32); zero padding rows AFTER the norm (matches reference,
    #      which zero-pads norm(x) before the bias-free qkv projection). ----
    x = x_ref[...]
    mu = jnp.mean(x, axis=-1, keepdims=True)
    var = jnp.mean((x - mu) ** 2, axis=-1, keepdims=True)
    xn = (x - mu) * lax.rsqrt(var + 1e-5) * g_ref[...] + b_ref[...]
    if pad_len > 0:
        row_idx = lax.broadcasted_iota(jnp.int32, (npad, 1), 0)
        xn = jnp.where(row_idx >= pad_len, xn, 0.0)

    # ---- QKV projection (bf16 operands, f32 accumulation) ----
    qkv = _mm(xn.astype(jnp.bfloat16), wqkv_ref[...])            # (npad, 3*inner)
    q = qkv[:, :inner] * scale
    k = qkv[:, inner:2 * inner]
    v = qkv[:, 2 * inner:]

    # ---- landmark means (f32; pooling matmul avoids a sublane relayout) ----
    if l == 1:
        q_l, k_l = q, k
    else:
        grp = lax.broadcasted_iota(jnp.int32, (nl, npad), 1) // l
        row = lax.broadcasted_iota(jnp.int32, (nl, npad), 0)
        pool = jnp.where(grp == row, 1.0 / l, 0.0).astype(jnp.float32)
        q_l = _mm(pool, q)                                        # (nl, inner)
        k_l = _mm(pool, k)

    # ---- block-diagonal merged-head landmark matrices (review: merged-head
    #      matmuls with K=inner, N=heads*nl so the MXU runs full-width) ----
    r_id = lax.broadcasted_iota(jnp.int32, (hnl, inner), 0) // nl
    c_id = lax.broadcasted_iota(jnp.int32, (hnl, inner), 1) // dh
    bmask = r_id == c_id                                          # (hnl, inner)
    kl_bd = jnp.where(bmask, jnp.concatenate([k_l] * heads, axis=0),
                      0.0).astype(jnp.bfloat16)
    ql_bd = jnp.where(bmask, jnp.concatenate([q_l] * heads, axis=0),
                      0.0).astype(jnp.bfloat16)

    q_bf = q.astype(jnp.bfloat16)
    k_bf = k.astype(jnp.bfloat16)
    v_bf = v.astype(jnp.bfloat16)

    # ---- attn3 and attn3 @ v, merged over heads (computed first so the
    #      (hnl, npad) buffer is dead before attn1 is built) ----
    sim3 = _mm_nt(ql_bd, k_bf)                                    # (hnl, npad)
    a3 = _softmax_lastdim(sim3).astype(jnp.bfloat16)
    w3v = _mm(a3, v_bf)                                           # (hnl, inner)

    # ---- attn1: one merged matmul, softmax per 64-lane head block ----
    sim1 = _mm_nt(q_bf, kl_bd)                                    # (npad, hnl)
    a1_blocks = []
    for h in range(heads):
        a1_blocks.append(
            _softmax_lastdim(sim1[:, h * nl:(h + 1) * nl]).astype(jnp.bfloat16))
    a1 = jnp.concatenate(a1_blocks, axis=-1)                      # (npad, hnl)

    # ---- cheap attn2-only pre-pass: per-head attn2 (nl x nl) + global
    #      Moore-Penrose denominator (exact division: feeds the pinv) ----
    a2s = []
    cmax = None
    rmax = None
    for h in range(heads):
        sl = slice(h * dh, (h + 1) * dh)
        s2 = _mm_nt(q_l[:, sl], k_l[:, sl])                       # (nl, nl)
        s2 = s2 - jnp.max(s2, axis=-1, keepdims=True)
        e2 = jnp.exp(s2)
        a2 = e2 / jnp.sum(e2, axis=-1, keepdims=True)
        # a2 >= 0, so abs() is a no-op
        cm = jnp.max(jnp.sum(a2, axis=1, keepdims=True), axis=0, keepdims=True)
        rm = jnp.max(jnp.sum(a2, axis=0, keepdims=True), axis=1, keepdims=True)
        cmax = cm if cmax is None else jnp.maximum(cmax, cm)
        rmax = rm if rmax is None else jnp.maximum(rmax, rm)
        a2s.append(a2)
    denom = cmax * rmax                                           # (1, 1)

    # identity hoisted out of the head loop
    ii = lax.broadcasted_iota(jnp.int32, (nl, nl), 0)
    jj = lax.broadcasted_iota(jnp.int32, (nl, nl), 1)
    eye = jnp.where(ii == jj, 1.0, 0.0).astype(jnp.float32)

    # ---- per-head: 6-iteration Moore-Penrose pinv + z @ w3v (only small,
    #      nl-sized tensors live per head) ----
    zw3v_rows = []
    for h in range(heads):
        a2 = a2s[h]
        z0 = jnp.transpose(a2) / denom                            # a2.T / denom

        def pinv_body(_, zc, a2=a2):
            xz = _mm(a2, zc)
            t = 7.0 * eye - xz
            t = 15.0 * eye - _mm(xz, t)
            t = 13.0 * eye - _mm(xz, t)
            return 0.25 * _mm(zc, t)

        z = lax.fori_loop(0, iters, pinv_body, z0)
        # keep only this head's dh columns of its w3v row block -> block-diag row
        w3v_h = jnp.where(bmask[h * nl:(h + 1) * nl, :],
                          w3v[h * nl:(h + 1) * nl, :], 0.0)
        zw3v_rows.append(_mm(z, w3v_h))                           # (nl, inner)
    zw3v = jnp.concatenate(zw3v_rows, axis=0).astype(jnp.bfloat16)  # (hnl, inner)

    # ---- merged combine: out = attn1 @ (pinv(attn2) @ (attn3 @ v)) ----
    out_m = _mm(a1, zw3v)                                         # (npad, inner)

    # ---- residual depthwise conv over v along the sequence (33 taps):
    #      zero only the two 16-row halos; 4 partial accumulators. ----
    vpad_ref[0:16, :] = jnp.zeros((16, inner), jnp.float32)
    vpad_ref[16:16 + npad, :] = v
    vpad_ref[16 + npad:16 + npad + 16, :] = jnp.zeros((16, inner), jnp.float32)
    accs = [jnp.zeros((npad, inner), jnp.float32) for _ in range(4)]
    for kk in range(33):
        accs[kk % 4] = accs[kk % 4] + vpad_ref[kk:kk + npad, :] * wres_ref[kk:kk + 1, :]
    out_m = out_m + (accs[0] + accs[1]) + (accs[2] + accs[3])

    # ---- to_out projection (bf16 MXU, f32 accum) + fused residual add ----
    y = _mm(out_m.astype(jnp.bfloat16), wout_ref[...]) + bout_ref[...]
    o_ref[...] = x + y


def fused_trans_layer(x, p, cfg):
    """x: (n, dim) f32 -> x + NystromAttention(LayerNorm(x)), shape (n, dim)."""
    n, dim = x.shape
    heads, dh = cfg['heads'], cfg['dim_head']
    m = cfg['num_landmarks']
    iters = cfg['pinv_iterations']
    inner = heads * dh
    scale = dh ** -0.5

    l = int(math.ceil(n / m))
    npad = l * m                       # padded length (multiple of num_landmarks)
    pad_len = npad - n
    nl = npad // l                     # == num_landmarks
    hnl = heads * nl

    # front zero-pad (reference pads the normed input; the kernel re-zeroes the
    # padded rows after its in-kernel LayerNorm, so padding x with zeros here is
    # equivalent).  TODO(synk): move this pad into the kernel to save one HBM copy.
    x_pad = jnp.pad(x, ((pad_len, 0), (0, 0))) if pad_len > 0 else x

    w_qkv = p['attn']['w_qkv'].astype(jnp.bfloat16)               # (dim, 3*inner)
    w_out = p['attn']['w_out'].astype(jnp.bfloat16)               # (inner, dim)
    b_out = p['attn']['b_out'].reshape(1, dim)
    # per-feature taps of the depthwise residual conv (broadcast over dim_head)
    w_res = jnp.broadcast_to(p['attn']['w_res'].T[:, :, None],
                             (33, heads, dh)).reshape(33, inner)

    flops = (2 * npad * dim * 3 * inner                       # qkv
             + 2 * npad * inner * hnl * 2                     # sim1 + final combine
             + 2 * hnl * inner * npad * 2                     # sim3 + attn3@v
             + heads * (2 * nl * nl * dh                      # attn2
                        + iters * 8 * nl ** 3                 # pinv
                        + 2 * nl * nl * inner)                # z @ w3v
             + 2 * npad * inner * dim                         # to_out
             + 33 * 2 * npad * inner)                         # residual conv
    transcend = npad * hnl + hnl * npad + heads * nl * nl
    bytes_acc = (4 * 2 * npad * dim + 2 * (dim * 3 * inner + inner * dim)
                 + 4 * (33 * inner + 3 * dim))

    out = pl.pallas_call(
        partial(_translayer_kernel, heads=heads, dh=dh, nl=nl, l=l,
                pad_len=pad_len, iters=iters, scale=scale),
        out_shape=jax.ShapeDtypeStruct((npad, dim), jnp.float32),
        grid=(1,),   # TODO(synk): flash-style token tiling (parallel grid) for v7x
        in_specs=[pl.BlockSpec((npad, dim), lambda i: (0, 0)),
                  pl.BlockSpec((1, dim), lambda i: (0, 0)),
                  pl.BlockSpec((1, dim), lambda i: (0, 0)),
                  pl.BlockSpec((dim, 3 * inner), lambda i: (0, 0)),
                  pl.BlockSpec((33, inner), lambda i: (0, 0)),
                  pl.BlockSpec((inner, dim), lambda i: (0, 0)),
                  pl.BlockSpec((1, dim), lambda i: (0, 0))],
        out_specs=pl.BlockSpec((npad, dim), lambda i: (0, 0)),
        scratch_shapes=[pltpu.VMEM((npad + 32, inner), jnp.float32)],
        compiler_params=pltpu.CompilerParams(
            dimension_semantics=("arbitrary",),
            vmem_limit_bytes=_vmem_limit()),
        cost_estimate=pl.CostEstimate(flops=int(flops), transcendentals=int(transcend),
                                      bytes_accessed=int(bytes_acc)),
    )(x_pad, p['norm_g'].reshape(1, dim), p['norm_b'].reshape(1, dim),
      w_qkv, w_res, w_out, b_out)
    return out[-n:]


# ----------------------------------------------------------------------------
# Token-tiled linear (+ optional fused ReLU), bf16 operands / f32 accumulation
# ----------------------------------------------------------------------------

def _linear_kernel(x_ref, w_ref, b_ref, o_ref, *, relu):
    y = jnp.dot(x_ref[...], w_ref[...], preferred_element_type=jnp.float32)
    y = y + b_ref[...]
    if relu:
        y = jnp.maximum(y, 0.0)
    o_ref[...] = y


def pallas_linear(x, w, b, relu=False, block_m=1024):
    M, K = x.shape
    N = w.shape[1]
    bm = M if M <= block_m else block_m
    grid = (pl.cdiv(M, bm),)
    return pl.pallas_call(
        partial(_linear_kernel, relu=relu),
        out_shape=jax.ShapeDtypeStruct((M, N), jnp.float32),
        grid=grid,
        in_specs=[pl.BlockSpec((bm, K), lambda i: (i, 0)),
                  pl.BlockSpec((K, N), lambda i: (0, 0)),
                  pl.BlockSpec((1, N), lambda i: (0, 0))],
        out_specs=pl.BlockSpec((bm, N), lambda i: (i, 0)),
        compiler_params=pltpu.CompilerParams(
            dimension_semantics=("parallel",),
            vmem_limit_bytes=_vmem_limit()),
        cost_estimate=pl.CostEstimate(flops=2 * M * K * N, transcendentals=0,
                                      bytes_accessed=2 * M * K + 2 * K * N + 4 * M * N),
    )(x.astype(jnp.bfloat16), w.astype(jnp.bfloat16), b.reshape(1, N))


# ----------------------------------------------------------------------------
# Fused classifier head: LayerNorm(cls token) -> fc2
# ----------------------------------------------------------------------------

def _cls_head_kernel(x_ref, g_ref, b_ref, w_ref, bw_ref, o_ref):
    x = x_ref[...]
    mu = jnp.mean(x, axis=-1, keepdims=True)
    var = jnp.mean((x - mu) ** 2, axis=-1, keepdims=True)
    xn = (x - mu) * lax.rsqrt(var + 1e-5) * g_ref[...] + b_ref[...]
    o_ref[...] = jnp.dot(xn, w_ref[...],
                         preferred_element_type=jnp.float32) + bw_ref[...]


def pallas_cls_head(x_cls, g, b, w, bw):
    dim = x_cls.shape[1]
    nc = w.shape[1]
    return pl.pallas_call(
        _cls_head_kernel,
        out_shape=jax.ShapeDtypeStruct((1, nc), jnp.float32),
        grid=(1,),
        in_specs=[pl.BlockSpec((1, dim), lambda i: (0, 0)),
                  pl.BlockSpec((1, dim), lambda i: (0, 0)),
                  pl.BlockSpec((1, dim), lambda i: (0, 0)),
                  pl.BlockSpec((dim, nc), lambda i: (0, 0)),
                  pl.BlockSpec((1, nc), lambda i: (0, 0))],
        out_specs=pl.BlockSpec((1, nc), lambda i: (0, 0)),
    )(x_cls, g.reshape(1, dim), b.reshape(1, dim), w, bw.reshape(1, nc))


# ----------------------------------------------------------------------------
# PPEG: identity + depthwise 7x7 + 5x5 + 3x3 folded into ONE 7x7 depthwise
# kernel (same padding, stride 1 => exact).  Channel-block parallel grid.
# ----------------------------------------------------------------------------

def _ppeg_kernel(xp_ref, w_ref, b_ref, o_ref):
    H, W, _ = o_ref.shape
    acc0 = jnp.zeros(o_ref.shape, jnp.float32)
    acc1 = jnp.zeros(o_ref.shape, jnp.float32)
    for ky in range(7):
        slab = xp_ref[ky:ky + H, :, :]          # one row-slab read per ky, reused
        for kx in range(7):
            term = slab[:, kx:kx + W, :] * w_ref[ky:ky + 1, kx:kx + 1, :]
            if kx % 2 == 0:
                acc0 = acc0 + term
            else:
                acc1 = acc1 + term
    o_ref[...] = acc0 + acc1 + b_ref[...]


def pallas_ppeg_conv(img_hwc, w7, w5, w3, bias_sum):
    H, W, C = img_hwc.shape
    # fold identity + 5x5 + 3x3 into the 7x7 kernel (all are 'same' depthwise)
    wc = w7
    wc = wc.at[1:6, 1:6, :].add(w5)
    wc = wc.at[2:5, 2:5, :].add(w3)
    wc = wc.at[3:4, 3:4, :].add(1.0)
    xp = jnp.pad(img_hwc, ((3, 3), (3, 3), (0, 0)))
    tc = C if C <= 128 else 128
    assert C % tc == 0
    grid = (C // tc,)
    return pl.pallas_call(
        _ppeg_kernel,
        out_shape=jax.ShapeDtypeStruct((H, W, C), jnp.float32),
        grid=grid,
        in_specs=[pl.BlockSpec((H + 6, W + 6, tc), lambda c: (0, 0, c)),
                  pl.BlockSpec((7, 7, tc), lambda c: (0, 0, c)),
                  pl.BlockSpec((1, 1, tc), lambda c: (0, 0, c))],
        out_specs=pl.BlockSpec((H, W, tc), lambda c: (0, 0, c)),
        compiler_params=pltpu.CompilerParams(
            dimension_semantics=("parallel",),
            vmem_limit_bytes=_vmem_limit()),
    )(xp, wc, bias_sum.reshape(1, 1, C))


def ppeg(h, Hh, Ww, p):
    S, C = h.shape
    assert S == Hh * Ww + 1
    cls_tok = h[:1]
    img = h[1:].reshape(Hh, Ww, C)
    out_img = pallas_ppeg_conv(img, p['w7'], p['w5'], p['w3'],
                               p['b7'] + p['b5'] + p['b3'])
    return jnp.concatenate([cls_tok, out_img.reshape(Hh * Ww, C)], axis=0)


# ----------------------------------------------------------------------------
# TransMIL forward
# ----------------------------------------------------------------------------

def transmil_forward(data, params, cfg):
    dim = cfg['dim']
    outs = []
    for x in data:                                               # x: (N_i, 1024)
        h = pallas_linear(x, params['fc1_w'], params['fc1_b'], relu=True)
        Hn = h.shape[0]
        _H = _W = int(math.ceil(math.sqrt(Hn)))
        add_length = _H * _W - Hn
        h = jnp.concatenate([h, h[:add_length]], axis=0)         # square padding
        h = jnp.concatenate([params['cls_token'].reshape(1, dim), h], axis=0)
        h = fused_trans_layer(h, params['layer1'], cfg)
        h = ppeg(h, _H, _W, params['ppeg'])
        h = fused_trans_layer(h, params['layer2'], cfg)
        logits = pallas_cls_head(h[:1], params['norm_g'], params['norm_b'],
                                 params['fc2_w'], params['fc2_b'])
        outs.append(logits)
    return jnp.concatenate(outs, axis=0)


# ----------------------------------------------------------------------------
# Deterministic synthetic parameters
# ----------------------------------------------------------------------------

def init_params(key, dim, n_classes, heads, dim_head):
    inner = heads * dim_head
    keys = iter(jax.random.split(key, 32))

    def nrm(shape, scale=0.02):
        return scale * jax.random.normal(next(keys), shape, dtype=jnp.float32)

    def attn_params():
        return dict(w_qkv=nrm((dim, 3 * inner)),
                    w_out=nrm((inner, dim)), b_out=nrm((dim,)),
                    w_res=nrm((heads, 33)))

    def layer_params():
        return dict(norm_g=jnp.ones((dim,), jnp.float32),
                    norm_b=jnp.zeros((dim,), jnp.float32),
                    attn=attn_params())

    return dict(
        fc1_w=nrm((1024, dim)), fc1_b=nrm((dim,)),
        cls_token=nrm((1, 1, dim), scale=1.0),
        layer1=layer_params(), layer2=layer_params(),
        ppeg=dict(w7=nrm((7, 7, dim)), b7=nrm((dim,)),
                  w5=nrm((5, 5, dim)), b5=nrm((dim,)),
                  w3=nrm((3, 3, dim)), b3=nrm((dim,))),
        norm_g=jnp.ones((dim,), jnp.float32),
        norm_b=jnp.zeros((dim,), jnp.float32),
        fc2_w=nrm((dim, n_classes)), fc2_b=nrm((n_classes,)),
    )


if __name__ == "__main__":
    DIM = 128                    # transmil_size (small, same structure as 512)
    N_CLASSES = 2
    HEADS = 8
    DIM_HEAD = DIM // 8
    cfg = dict(dim=DIM, heads=HEADS, dim_head=DIM_HEAD,
               num_landmarks=DIM // 2, pinv_iterations=6)

    key = jax.random.PRNGKey(0)
    kp, kd1, kd2 = jax.random.split(key, 3)
    params = init_params(kp, DIM, N_CLASSES, HEADS, DIM_HEAD)

    # data is a list of bags, each (N_i, 1024) like the PyTorch module expects.
    data = [jax.random.normal(kd1, (7, 1024), jnp.float32),
            jax.random.normal(kd2, (5, 1024), jnp.float32)]

    logits = transmil_forward(data, params, cfg)
    logits = jax.block_until_ready(logits)
    assert logits.shape == (len(data), N_CLASSES)
    assert bool(jnp.all(jnp.isfinite(logits)))
    print("KERNEL_OK")
</pallas_src>

<mosaic_0001>
module attributes {stable_mosaic.version = 11 : i64} {
  func.func @_linear_kernel(%arg0: i32, %arg1: memref<7x1024xbf16, #tpu.memory_space<vmem>>, %arg2: memref<1024x128xbf16, #tpu.memory_space<vmem>>, %arg3: memref<1x128xf32, #tpu.memory_space<vmem>>, %arg4: memref<7x128xf32, #tpu.memory_space<vmem>>) attributes {dimension_semantics = [#tpu.dimension_semantics<parallel>], iteration_bounds = array<i64: 1>, scalar_prefetch = 0 : i64, scratch_operands = 0 : i64, tpu.core_type = #tpu.core_type<tc>, window_params = [{transform_indices = @transform_0, window_bounds = array<i64: 7, 1024>}, {pipeline_mode = #tpu.pipeline_mode<synchronous>, transform_indices = @transform_1, window_bounds = array<i64: 1024, 128>}, {pipeline_mode = #tpu.pipeline_mode<synchronous>, transform_indices = @transform_2, window_bounds = array<i64: 1, 128>}, {transform_indices = @transform_3, window_bounds = array<i64: 7, 128>}]} {
    %c0 = arith.constant 0 : index
    %c0_0 = arith.constant 0 : index
    %0 = vector.load %arg1[%c0, %c0_0] : memref<7x1024xbf16, #tpu.memory_space<vmem>>, vector<7x1024xbf16>
    %c0_1 = arith.constant 0 : index
    %c0_2 = arith.constant 0 : index
    %1 = vector.load %arg2[%c0_1, %c0_2] : memref<1024x128xbf16, #tpu.memory_space<vmem>>, vector<1024x128xbf16>
    %cst = arith.constant dense<0.000000e+00> : vector<7x128xf32>
    %2 = tpu.matmul %0, %1, %cst {dimension_numbers = #tpu.dot_dimension_numbers<[1], [0], [0], [1], [0, 0, 1, 1], [], []>} : vector<7x1024xbf16>, vector<1024x128xbf16>, vector<7x128xf32> -> vector<7x128xf32>
    %c0_3 = arith.constant 0 : index
    %c0_4 = arith.constant 0 : index
    %3 = vector.load %arg3[%c0_3, %c0_4] : memref<1x128xf32, #tpu.memory_space<vmem>>, vector<1x128xf32>
    %4 = vector.broadcast %3 : vector<1x128xf32> to vector<7x128xf32>
    %5 = arith.addf %2, %4 : vector<7x128xf32>
    %cst_5 = arith.constant 0.000000e+00 : f32
    %6 = vector.broadcast %cst_5 : f32 to vector<7x128xf32>
    %7 = arith.maximumf %5, %6 : vector<7x128xf32>
    %c0_6 = arith.constant 0 : index
    %c0_7 = arith.constant 0 : index
    %8 = vector.load %arg4[%c0_6, %c0_7] : memref<7x128xf32, #tpu.memory_space<vmem>>, vector<7x128xf32>
    tpu.vector_store %arg4[%c0_6, %c0_7], %7 {strides = array<i32>} : memref<7x128xf32, #tpu.memory_space<vmem>>, vector<7x128xf32>,
    return
  }
  func.func @transform_0(%arg0: i32) -> (i32, i32) {
    %c0_i32 = arith.constant 0 : i32
    %c0_i32_0 = arith.constant 0 : i32
    return %arg0, %c0_i32 : i32, i32
  }
  func.func @transform_1(%arg0: i32) -> (i32, i32) {
    %c0_i32 = arith.constant 0 : i32
    %c0_i32_0 = arith.constant 0 : i32
    %c0_i32_1 = arith.constant 0 : i32
    return %c0_i32, %c0_i32_0 : i32, i32
  }
  func.func @transform_2(%arg0: i32) -> (i32, i32) {
    %c0_i32 = arith.constant 0 : i32
    %c0_i32_0 = arith.constant 0 : i32
    %c0_i32_1 = arith.constant 0 : i32
    return %c0_i32, %c0_i32_0 : i32, i32
  }
  func.func @transform_3(%arg0: i32) -> (i32, i32) {
    %c0_i32 = arith.constant 0 : i32
    %c0_i32_0 = arith.constant 0 : i32
    return %arg0, %c0_i32 : i32, i32
  }
}

</mosaic_0001>

<bundles_post_ra>
// kernel: tpu_custom_call.1
= control target key start
LH: loop header
LB: loop body
LE: loop exit
PB: predicated region body
PF: predicated region fallthrough
CT: control target
= control target key end

     0   :  { %8 = vsyncpa [#allocation3], 0  ;;  %s1158_s0 = inlined_call_operand.hbm [shape: bf16[7,1024], index: 0, kind: input, shape index: {}]   ;;  %s1159_s1 = inlined_call_operand.hbm [shape: bf16[1024,128], index: 1, kind: input, shape index: {}]   ;;  %s1160_s2 = inlined_call_operand.vmem [shape: f32[1,128], index: 2, kind: input, shape index: {}]   ;;  %s1161_s3 = inlined_call_operand.hbm [shape: f32[7,128], index: 3, kind: output, shape index: {}]  }
   0x1   :  { %9 = vsyncpa [#allocation6], 0 }
   0x2   :  { %10 = vsyncpa [#allocation4], 0  ;;  %s16_s14 = sshll.u32 %s1158_s0, 4  ;;  %s1121_s15 = smov [#allocation2]   ;;  %s17_s14 = int_to_ptr.hbm [resolvable:$true] %s16_s14 }
   0x3   :  { %s18_s16 = sshll.u32 %s1121_s15, 4  ;;  %s26_s19 = sshll.u32 %s1159_s1, 4  ;;  %s19_s16 = int_to_ptr.vmem [resolvable:$true] %s18_s16  ;;  %s27_s19 = int_to_ptr.hbm [resolvable:$true] %s26_s19 }
   0x4   :  { %21 = dma.hbm_to_vmem [thread:$0]  %s17_s14, 512, %s19_s16, [#allocation3]  }
   0x5   :  { %s1122_s20 = smov [#allocation5]   ;;  %s1123_s22 = smov 64  }
   0x6   :  { %s28_s21 = sshll.u32 %s1122_s20, 4  ;;  %s1124_s23 = smov 4   ;;  %s29_s21 = int_to_ptr.vmem [resolvable:$true] %s28_s21 }
   0x7   :  { %34 = dma.hbm_to_vmem [thread:$0]  %s27_s19, 8192, %s29_s21, [#allocation6], %s1123_s22, %s1123_s22, %s1124_s23  }
   0x8   :  { %1115 = dma.done.wait [#allocation3], 512  }
   0x9   :  { %1116 = vsyncadd [#allocation3], 4294966784 }
   0xa   :  { %1117 = dma.done.wait [#allocation6], 8192  }
   0xb   :  { %1118 = vsyncadd [#allocation6], 4294959104  ;;  %v980_v0 = vld [vmem:[#allocation5 + $0x38] sm:$0xff]  ;;  %v979_v4 = vld [vmem:[#allocation5 + $0x30] sm:$0xff]  ;;  %s1125_s24 = smov [#allocation7]  }
   0xc   :  { %v988_v1 = vld [vmem:[#allocation5 + $0x78] sm:$0xff]  ;;  %593 = vmatpush.bf16.msra.mxu0 %v980_v0  ;;  %v987_v5 = vld [vmem:[#allocation5 + $0x70] sm:$0xff]  ;;  %v978_v8 = vld [vmem:[#allocation5 + $0x28] sm:$0xff]  ;;  %s704_s25 = sshll.u32 %s1125_s24, 4  ;;  %s705_s25 = int_to_ptr.vmem [resolvable:$true] %s704_s25 }
   0xd   :  { %v996_v2 = vld [vmem:[#allocation5 + $0xb8] sm:$0xff]  ;;  %606 = vmatpush.bf16.msra.mxu1 %v988_v1  ;;  %v995_v6 = vld [vmem:[#allocation5 + $0xb0] sm:$0xff]  ;;  %v986_v9 = vld [vmem:[#allocation5 + $0x68] sm:$0xff] }
   0xe   :  { %v1004_v3 = vld [vmem:[#allocation5 + $0xf8] sm:$0xff]  ;;  %619 = vmatpush.bf16.msra.mxu2 %v996_v2  ;;  %v1003_v7 = vld [vmem:[#allocation5 + $0xf0] sm:$0xff]  ;;  %v994_v10 = vld [vmem:[#allocation5 + $0xa8] sm:$0xff] }
   0xf   :  { %632 = vmatpush.bf16.msra.mxu3 %v1004_v3  ;;  %v1002_v11 = vld [vmem:[#allocation5 + $0xe8] sm:$0xff]  ;;  %v977_v12 = vld [vmem:[#allocation5 + $0x20] sm:$0xff]  ;;  %v976_v16 = vld [vmem:[#allocation5 + $0x18] sm:$0xff] }
  0x10   :  { %594 = vmatpush.bf16.msra.mxu0 %v979_v4  ;;  %v985_v13 = vld [vmem:[#allocation5 + $0x60] sm:$0xff]  ;;  %v984_v17 = vld [vmem:[#allocation5 + $0x58] sm:$0xff]  ;;  %v975_v20 = vld [vmem:[#allocation5 + $0x10] sm:$0xff] }
  0x11   :  { %607 = vmatpush.bf16.msra.mxu1 %v987_v5  ;;  %v993_v14 = vld [vmem:[#allocation5 + $0xa0] sm:$0xff]  ;;  %v992_v18 = vld [vmem:[#allocation5 + $0x98] sm:$0xff]  ;;  %v983_v21 = vld [vmem:[#allocation5 + $0x50] sm:$0xff] }
  0x12   :  { %620 = vmatpush.bf16.msra.mxu2 %v995_v6  ;;  %v1001_v15 = vld [vmem:[#allocation5 + $0xe0] sm:$0xff]  ;;  %v1000_v19 = vld [vmem:[#allocation5 + $0xd8] sm:$0xff]  ;;  %v991_v22 = vld [vmem:[#allocation5 + $0x90] sm:$0xff] }
  0x13   :  { %633 = vmatpush.bf16.msra.mxu3 %v1003_v7  ;;  %v999_v23 = vld [vmem:[#allocation5 + $0xd0] sm:$0xff]  ;;  %v974_v24 = vld [vmem:[#allocation5 + $0x8] sm:$0xff]  ;;  %v45_v29 = vld [vmem:[#allocation2] sm:$0xff] }
  0x14   :  { %595 = vmatpush.bf16.msra.mxu0 %v978_v8  ;;  %v982_v25 = vld [vmem:[#allocation5 + $0x48] sm:$0xff]  ;;  %v973_v30 = vld [vmem:[#allocation5] sm:$0xff]  ;;  %v185_v36 = vunpack.c.l.b16 %v45_v29  ;;  %v186_v37 = vunpack.c.h.b16 %v45_v29  ;;  %v1012_v38 = vld [vmem:[#allocation5 + $0x138] sm:$0xff] }
  0x15   :  { %608 = vmatpush.bf16.msra.mxu1 %v986_v9  ;;  %v990_v26 = vld [vmem:[#allocation5 + $0x88] sm:$0xff]  ;;  %v981_v31 = vld [vmem:[#allocation5 + $0x40] sm:$0xff]  ;;  %v1020_v39 = vld [vmem:[#allocation5 + $0x178] sm:$0xff] }
  0x16   :  { %621 = vmatpush.bf16.msra.mxu2 %v994_v10  ;;  %v998_v27 = vld [vmem:[#allocation5 + $0xc8] sm:$0xff]  ;;  %v989_v34 = vld [vmem:[#allocation5 + $0x80] sm:$0xff]  ;;  %v1028_v40 = vld [vmem:[#allocation5 + $0x1b8] sm:$0xff]  ;;  %v193_v44 = vpack.c.b16 %v185_v36, %v185_v36  ;;  %v194_v45 = vpack.c.b16 %v186_v37, %v186_v37 }
  0x17   :  { %634 = vmatpush.bf16.msra.mxu3 %v1002_v11  ;;  %v46_v28 = vld [vmem:[#allocation2 + $0x8] sm:$0xff]  ;;  %v997_v35 = vld [vmem:[#allocation5 + $0xc0] sm:$0xff]  ;;  %v1036_v41 = vld [vmem:[#allocation5 + $0x1f8] sm:$0xff] }
  0x18   :  { %596 = vmatpush.bf16.msra.mxu0 %v977_v12  ;;  %v187_v32 = vunpack.c.l.b16 %v46_v28  ;;  %v188_v33 = vunpack.c.h.b16 %v46_v28  ;;  %v1011_v46 = vld [vmem:[#allocation5 + $0x130] sm:$0xff]  ;;  %v1010_v50 = vld [vmem:[#allocation5 + $0x128] sm:$0xff]  ;;  %v1009_v54 = vld [vmem:[#allocation5 + $0x120] sm:$0xff] }
  0x19   :  { %609 = vmatpush.bf16.msra.mxu1 %v985_v13  ;;  %v1019_v47 = vld [vmem:[#allocation5 + $0x170] sm:$0xff]  ;;  %v1018_v51 = vld [vmem:[#allocation5 + $0x168] sm:$0xff]  ;;  %v1017_v55 = vld [vmem:[#allocation5 + $0x160] sm:$0xff] }
  0x1a   :  { %622 = vmatpush.bf16.msra.mxu2 %v993_v14  ;;  %v195_v42 = vpack.c.b16 %v187_v32, %v187_v32  ;;  %v196_v43 = vpack.c.b16 %v188_v33, %v188_v33  ;;  %v1027_v48 = vld [vmem:[#allocation5 + $0x1b0] sm:$0xff]  ;;  %v1026_v52 = vld [vmem:[#allocation5 + $0x1a8] sm:$0xff]  ;;  %v1025_v56 = vld [vmem:[#allocation5 + $0x1a0] sm:$0xff] }
  0x1b   :  { %635 = vmatpush.bf16.msra.mxu3 %v1001_v15  ;;  %v1035_v49 = vld [vmem:[#allocation5 + $0x1f0] sm:$0xff]  ;;  %v1034_v53 = vld [vmem:[#allocation5 + $0x1e8] sm:$0xff]  ;;  %v1033_v57 = vld [vmem:[#allocation5 + $0x1e0] sm:$0xff] }
  0x1c   :  { %597 = vmatpush.bf16.msra.mxu0 %v976_v16  ;;  %v1008_v58 = vld [vmem:[#allocation5 + $0x118] sm:$0xff]  ;;  %v1007_v62 = vld [vmem:[#allocation5 + $0x110] sm:$0xff]  ;;  %v1006_v2 = vld [vmem:[#allocation5 + $0x108] sm:$0xff] }
  0x1d   :  { %610 = vmatpush.bf16.msra.mxu1 %v984_v17  ;;  %v1016_v59 = vld [vmem:[#allocation5 + $0x158] sm:$0xff]  ;;  %v1015_v63 = vld [vmem:[#allocation5 + $0x150] sm:$0xff]  ;;  %v1014_v3 = vld [vmem:[#allocation5 + $0x148] sm:$0xff] }
  0x1e   :  { %623 = vmatpush.bf16.msra.mxu2 %v992_v18  ;;  %v1024_v60 = vld [vmem:[#allocation5 + $0x198] sm:$0xff]  ;;  %v1023_v0 = vld [vmem:[#allocation5 + $0x190] sm:$0xff]  ;;  %v1022_v5 = vld [vmem:[#allocation5 + $0x188] sm:$0xff] }
  0x1f   :  { %636 = vmatpush.bf16.msra.mxu3 %v1000_v19  ;;  %v1032_v61 = vld [vmem:[#allocation5 + $0x1d8] sm:$0xff]  ;;  %v1031_v1 = vld [vmem:[#allocation5 + $0x1d0] sm:$0xff]  ;;  %v1030_v6 = vld [vmem:[#allocation5 + $0x1c8] sm:$0xff] }
  0x20   :  { %598 = vmatpush.bf16.msra.mxu0 %v975_v20  ;;  %v47_v4 = vld [vmem:[#allocation2 + $0x10] sm:$0xff]  ;;  %v48_v7 = vld [vmem:[#allocation2 + $0x18] sm:$0xff]  ;;  %v1005_v10 = vld [vmem:[#allocation5 + $0x100] sm:$0xff] }
  0x21   :  { %611 = vmatpush.bf16.msra.mxu1 %v983_v21  ;;  %v189_v8 = vunpack.c.l.b16 %v47_v4  ;;  %v190_v9 = vunpack.c.h.b16 %v47_v4  ;;  %v1013_v11 = vld [vmem:[#allocation5 + $0x140] sm:$0xff]  ;;  %v191_v12 = vunpack.c.l.b16 %v48_v7  ;;  %v192_v13 = vunpack.c.h.b16 %v48_v7 }
  0x22   :  { %624 = vmatpush.bf16.msra.mxu2 %v991_v22  ;;  %v1021_v14 = vld [vmem:[#allocation5 + $0x180] sm:$0xff] }
  0x23   :  { %637 = vmatpush.bf16.msra.mxu3 %v999_v23  ;;  %v1029_v15 = vld [vmem:[#allocation5 + $0x1c0] sm:$0xff]  ;;  %v197_v16 = vpack.c.b16 %v189_v8, %v189_v8  ;;  %v198_v17 = vpack.c.b16 %v190_v9, %v190_v9  ;;  %v199_v18 = vpack.c.b16 %v191_v12, %v191_v12  ;;  %v200_v19 = vpack.c.b16 %v192_v13, %v192_v13 }
  0x24   :  { %599 = vmatpush.bf16.msra.mxu0 %v974_v24 }
  0x25   :  { %612 = vmatpush.bf16.msra.mxu1 %v982_v25 }
  0x26   :  { %625 = vmatpush.bf16.msra.mxu2 %v990_v26  ;;  %v1042_v26 = vld [vmem:[%s1160_s2] ss:$0 sm:$0xff]  ;;  %s706_s2 = sshll.u32 %s1161_s3, 4  ;;  %s707_s2 = int_to_ptr.hbm [resolvable:$true] %s706_s2 }
  0x27   :  { %638 = vmatpush.bf16.msra.mxu3 %v998_v27 }
  0x28   :  { %600 = vmatpush.bf16.msra.mxu0 %v973_v30 }
  0x29   :  { %613 = vmatpush.bf16.msra.mxu1 %v981_v31 }
  0x2a   :  { %626 = vmatpush.bf16.msra.mxu2 %v989_v34 }
  0x2b   :  { %639 = vmatpush.bf16.msra.mxu3 %v997_v35  ;;  %601 = vmatmul.bf16.vlgmr.msra.gmra.mxu0 %v193_v44 }
  0x2c   :  { %645 = vmatpush.bf16.msrb.mxu0 %v1012_v38  ;;  %614 = vmatmul.bf16.vlgmr.msra.gmra.mxu1 %v194_v45 }
  0x2d   :  { %658 = vmatpush.bf16.msrb.mxu1 %v1020_v39  ;;  %627 = vmatmul.bf16.vlgmr.msra.gmra.mxu2 %v195_v42 }
  0x2e   :  { %671 = vmatpush.bf16.msrb.mxu2 %v1028_v40  ;;  %640 = vmatmul.bf16.vlgmr.msra.gmra.mxu3 %v196_v43 }
  0x2f   :  { %684 = vmatpush.bf16.msrb.mxu3 %v1036_v41 }
  0x30   :  { %646 = vmatpush.bf16.msrb.mxu0 %v1011_v46 }
  0x31   :  { %659 = vmatpush.bf16.msrb.mxu1 %v1019_v47 }
  0x32   :  { %672 = vmatpush.bf16.msrb.mxu2 %v1027_v48 }
  0x33   :  { %685 = vmatpush.bf16.msrb.mxu3 %v1035_v49 }
  0x34   :  { %647 = vmatpush.bf16.msrb.mxu0 %v1010_v50 }
  0x35   :  { %660 = vmatpush.bf16.msrb.mxu1 %v1018_v51 }
  0x36   :  { %673 = vmatpush.bf16.msrb.mxu2 %v1026_v52 }
  0x37   :  { %686 = vmatpush.bf16.msrb.mxu3 %v1034_v53 }
  0x38   :  { %648 = vmatpush.bf16.msrb.mxu0 %v1009_v54 }
  0x39   :  { %661 = vmatpush.bf16.msrb.mxu1 %v1017_v55 }
  0x3a   :  { %674 = vmatpush.bf16.msrb.mxu2 %v1025_v56 }
  0x3b   :  { %687 = vmatpush.bf16.msrb.mxu3 %v1033_v57 }
  0x3c   :  { %649 = vmatpush.bf16.msrb.mxu0 %v1008_v58 }
  0x3d   :  { %662 = vmatpush.bf16.msrb.mxu1 %v1016_v59 }
  0x3e   :  { %675 = vmatpush.bf16.msrb.mxu2 %v1024_v60 }
  0x3f   :  { %688 = vmatpush.bf16.msrb.mxu3 %v1032_v61 }
  0x40   :  { %650 = vmatpush.bf16.msrb.mxu0 %v1007_v62 }
  0x41   :  { %663 = vmatpush.bf16.msrb.mxu1 %v1015_v63 }
  0x42   :  { %676 = vmatpush.bf16.msrb.mxu2 %v1023_v0 }
  0x43   :  { %689 = vmatpush.bf16.msrb.mxu3 %v1031_v1 }
  0x44   :  { %651 = vmatpush.bf16.msrb.mxu0 %v1006_v2 }
  0x45   :  { %664 = vmatpush.bf16.msrb.mxu1 %v1014_v3 }
  0x46   :  { %677 = vmatpush.bf16.msrb.mxu2 %v1022_v5 }
  0x47   :  { %690 = vmatpush.bf16.msrb.mxu3 %v1030_v6 }
  0x48   :  { %652 = vmatpush.bf16.msrb.mxu0 %v1005_v10 }
  0x49   :  { %665 = vmatpush.bf16.msrb.mxu1 %v1013_v11 }
  0x4a   :  { %678 = vmatpush.bf16.msrb.mxu2 %v1021_v14 }
  0x4b   :  { %691 = vmatpush.bf16.msrb.mxu3 %v1029_v15  ;;  %653 = vmatmul.bf16.vlgmr.msrb.gmra.mxu0 %v197_v16 }
  0x4c   :  { %666 = vmatmul.bf16.vlgmr.msrb.gmra.mxu1 %v198_v17 }
  0x4d   :  { %679 = vmatmul.bf16.vlgmr.msrb.gmra.mxu2 %v199_v18 }
  0x4e   :  { %692 = vmatmul.bf16.vlgmr.msrb.gmra.mxu3 %v200_v19 }
  0xa8   :  { %v602_v20 = vpop.f32.mrf.mxu0 }
  0xa9   :  { %v615_v21 = vpop.f32.mrf.mxu1  ;;  %v603_v29 = vadd.f32 %v1042_v26, %v602_v20 }
  0xab   :  { %v616_v30 = vadd.f32 %v615_v21, %v603_v29 }
  0xb0   :  { %v628_v22 = vpop.f32.mrf.mxu2  ;;  %v604_v24 = vpop.f32.mrf.mxu0 }
  0xb1   :  { %v641_v23 = vpop.f32.mrf.mxu3  ;;  %v617_v25 = vpop.f32.mrf.mxu1  ;;  %v629_v31 = vadd.f32 %v628_v22, %v616_v30 }
  0xb3   :  { %v642_v32 = vadd.f32 %v641_v23, %v629_v31 }
  0xb8   :  { %v630_v27 = vpop.f32.mrf.mxu2 }
  0xb9   :  { %v643_v28 = vpop.f32.mrf.mxu3 }
  0xc8   :  { %v654_v33 = vpop.f32.mrf.mxu0 }
  0xc9   :  { %v667_v34 = vpop.f32.mrf.mxu1  ;;  %v655_v35 = vadd.f32 %v654_v33, %v642_v32 }
  0xcb   :  { %v668_v36 = vadd.f32 %v667_v34, %v655_v35 }
  0xd0   :  { %v680_v37 = vpop.f32.mrf.mxu2  ;;  %v656_v40 = vpop.f32.mrf.mxu0 }
  0xd1   :  { %v693_v38 = vpop.f32.mrf.mxu3  ;;  %v681_v39 = vadd.f32 %v680_v37, %v668_v36  ;;  %v669_v41 = vpop.f32.mrf.mxu1 }
  0xd3   :  { %v694_v42 = vadd.f32 %v693_v38, %v681_v39 }
  0xd5   :  { %v697_v43 = vmax.f32 %v694_v42, 0.0 }
  0xd7   :  { %698 = vst [vmem:[#allocation7] sm:$0x7f] %v697_v43 }
  0xd8   :  { %v682_v44 = vpop.f32.mrf.mxu2  ;;  %709 = dma.vmem_to_hbm [thread:$0]  %s705_s25, 128, %s707_s2, [#allocation4]  }
  0xd9   :  { %v695_v45 = vpop.f32.mrf.mxu3 }
  0xda   :  { %1119 = dma.done.wait [#allocation4], 128  }
  0xdb   :  { %1120 = vsyncadd [#allocation4], 4294967168 }
  0xdc   :  { %714 = vsyncpa [#allocation3], 1 }
  0xdd   :  { %715 = vsyncpa [#allocation6], 1 }
  0xde   :  { %716 = vsyncpa [#allocation4], 1 }

</bundles_post_ra>
